<compile_context>
chip_gen: v7x
topology: tpu7x:2x2x1
jax: 0.10.0
libtpu: 0.0.40
codegen_flags: <defaults>
</compile_context>

<pallas_src>
import functools

import jax
import jax.numpy as jnp
from jax.experimental import pallas as pl
from jax.experimental.pallas import tpu as pltpu

_FIELD_BITS = 6   # each index (+ its band offset) fits in 6 bits (< 64)


def _stamp_kernel(code_ref, lane_ref, bd_ref, out_ref, *, pack):
    """code_ref: (TILE_G, pack) int32 packed codes (one per token).
    lane_ref:  (3, W) int32 resident table: row0=mask, row1=target, row2=band.
    bd_ref:    (W, pack*D) f32 resident block-diagonal fused embedding table.
    out_ref:   (TILE_G, pack*D) f32; row g holds `pack` consecutive token embeddings."""
    msk = lane_ref[0:1, :]            # (1, W)
    tgt = lane_ref[1:2, :]            # (1, W)
    band = lane_ref[2:3, :]           # (1, W): which packed token this lane belongs to

    # Expand each group row's `pack` codes across their 64-lane bands with VPU selects
    # (no MXU, no cross-lane gathers): cexp[g, c] = code[g, band[c]].
    cexp = code_ref[:, pack - 1:pack]                       # (TILE_G, 1)
    for j in range(pack - 2, -1, -1):                       # static unroll: pack-1 selects
        cexp = jnp.where(band == j, code_ref[:, j:j + 1], cexp)

    # One masked compare builds the whole 3-hot row (day/weekday/month) per token:
    # lanes [0,32) test the day field, [32,38) the weekday field, [38,64) the month field.
    multi_hot = ((cexp & msk) == tgt).astype(jnp.float32)   # (TILE_G, W)

    # Single fused gather+sum on the MXU; output rows are lane dense (pack*D == 128 wide).
    out_ref[...] = jnp.dot(multi_hot, bd_ref[...],
                           preferred_element_type=jnp.float32).astype(out_ref.dtype)


def _round_up(x, m):
    return (x + m - 1) // m * m


@functools.partial(jax.jit, static_argnames=("tile_tokens",))
def stamp_embedding(month, weekday, day, month_tab, week_tab, day_tab,
                    *, tile_tokens=8192):
    """month/weekday/day: int (...,); *_tab: (V, D) float32 -> (..., D) float32."""
    batch_shape = month.shape
    n = month.size
    day_v, d = day_tab.shape
    week_v = week_tab.shape[0]
    month_v = month_tab.shape[0]

    vpad = 64                               # fused vocab 32 + 6 + 13 = 51, padded to 64
    week_off = day_v                        # 32
    month_off = day_v + week_v              # 38
    assert month_off + month_v <= vpad
    assert day_v <= vpad and week_off + week_v <= vpad   # every field (+offset) < 64

    # Tokens packed per output row so each row is a full 128-lane store (4 for D=32).
    pack = 128 // d if (d <= 128 and 128 % d == 0) else 1
    w = pack * vpad

    # Fused table: day rows [0,32), weekday [32,38), month [38,51), zero padded to 64;
    # block-diagonal copy so vocab band j writes output columns [j*D, (j+1)*D).
    fused = jnp.concatenate(
        [day_tab.astype(jnp.float32),
         week_tab.astype(jnp.float32),
         month_tab.astype(jnp.float32),
         jnp.zeros((vpad - month_off - month_v, d), jnp.float32)], axis=0)
    if pack == 1:
        bd = fused
    else:
        eye = jnp.eye(pack, dtype=jnp.float32)
        bd = (eye[:, None, :, None] * fused[None, :, None, :]).reshape(w, pack * d)

    # One packed int32 code per token (all three lookups); band offsets are pre-added so
    # the kernel needs only a mask + compare per lane.
    code = (day.reshape(-1).astype(jnp.int32)
            | ((weekday.reshape(-1).astype(jnp.int32) + week_off) << _FIELD_BITS)
            | ((month.reshape(-1).astype(jnp.int32) + month_off) << (2 * _FIELD_BITS)))

    # Resident per-lane table: lane c belongs to token band c//64; its in-band position
    # m = c % 64 selects which 6-bit field of the code it tests.
    c = jnp.arange(w, dtype=jnp.int32)
    m = c & (vpad - 1)
    sh = jnp.where(m < week_off, 0,
                   jnp.where(m < month_off, _FIELD_BITS, 2 * _FIELD_BITS))
    lane_tab = jnp.stack([jnp.left_shift(vpad - 1, sh),   # mask
                          jnp.left_shift(m, sh),          # target
                          c // vpad],                     # band
                         axis=0).astype(jnp.int32)        # (3, W)

    # Tile selection: big tiles (amortize ~0.35us/step overhead) but >=4 grid steps for
    # large inputs so both v7x TensorCores get work on the "parallel" axis.
    g_raw = pl.cdiv(max(n, 1), pack)
    max_tile_g = max(8, min(4096, _round_up(max(tile_tokens // pack, 1), 8)))
    if g_raw >= 4 * 512:
        tile_g = min(max_tile_g, _round_up(pl.cdiv(g_raw, 4), 8))
    else:
        tile_g = min(max_tile_g, _round_up(g_raw, 8))
    tile_g = max(8, tile_g)
    g = _round_up(g_raw, tile_g)            # pad so the grid divides exactly
    n_pad = g * pack

    if n_pad != n:
        code = jnp.pad(code, (0, n_pad - n))   # pad tokens read row 0/32/38, sliced off below
    code = code.reshape(g, pack)
    grid = (g // tile_g,)

    kernel = functools.partial(_stamp_kernel, pack=pack)

    out = pl.pallas_call(
        kernel,
        out_shape=jax.ShapeDtypeStruct((g, pack * d), jnp.float32),
        grid=grid,
        in_specs=[
            pl.BlockSpec((tile_g, pack), lambda i: (i, 0)),   # packed codes
            pl.BlockSpec((3, w), lambda i: (0, 0)),           # per-lane table (resident)
            pl.BlockSpec((w, pack * d), lambda i: (0, 0)),    # fused table (resident)
        ],
        out_specs=pl.BlockSpec((tile_g, pack * d), lambda i: (i, 0)),
        compiler_params=pltpu.CompilerParams(
            dimension_semantics=("parallel",),
            vmem_limit_bytes=32 * 1024 * 1024,
        ),
    )(code, lane_tab, bd)

    out = out.reshape(n_pad, d)
    if n_pad != n:
        out = out[:n]
    return out.reshape(*batch_shape, d)


if __name__ == "__main__":
    out_dim = 32
    B, S = 2, 8

    key = jax.random.PRNGKey(0)
    k_day, k_week, k_month, k_i1, k_i2, k_i3 = jax.random.split(key, 6)

    # nn.Embedding default init: N(0, 1)
    day_tab = jax.random.normal(k_day, (32, out_dim), dtype=jnp.float32)
    week_tab = jax.random.normal(k_week, (6, out_dim), dtype=jnp.float32)
    month_tab = jax.random.normal(k_month, (13, out_dim), dtype=jnp.float32)

    month = jax.random.randint(k_i1, (B, S), 0, 13, dtype=jnp.int32)
    weekday = jax.random.randint(k_i2, (B, S), 0, 6, dtype=jnp.int32)
    day = jax.random.randint(k_i3, (B, S), 0, 32, dtype=jnp.int32)

    out = stamp_embedding(month, weekday, day, month_tab, week_tab, day_tab)
    out = jax.block_until_ready(out)

    # reference check in plain JAX
    ref = day_tab[day] + week_tab[weekday] + month_tab[month]
    assert out.shape == (B, S, out_dim)
    assert jnp.allclose(out, ref, atol=1e-5, rtol=1e-5)

    print("KERNEL_OK")
</pallas_src>

<mosaic_0001>
module attributes {stable_mosaic.version = 11 : i64} {
  func.func @_stamp_kernel(%arg0: i32, %arg1: memref<8x4xi32, #tpu.memory_space<vmem>>, %arg2: memref<3x256xi32, #tpu.memory_space<vmem>>, %arg3: memref<256x128xf32, #tpu.memory_space<vmem>>, %arg4: memref<8x128xf32, #tpu.memory_space<vmem>>) attributes {dimension_semantics = [#tpu.dimension_semantics<parallel>], iteration_bounds = array<i64: 1>, scalar_prefetch = 0 : i64, scratch_operands = 0 : i64, tpu.core_type = #tpu.core_type<tc>, window_params = [{transform_indices = @transform_0, window_bounds = array<i64: 8, 4>}, {pipeline_mode = #tpu.pipeline_mode<synchronous>, transform_indices = @transform_1, window_bounds = array<i64: 3, 256>}, {pipeline_mode = #tpu.pipeline_mode<synchronous>, transform_indices = @transform_2, window_bounds = array<i64: 256, 128>}, {transform_indices = @transform_3, window_bounds = array<i64: 8, 128>}]} {
    %c0 = arith.constant 0 : index
    %c0_0 = arith.constant 0 : index
    %0 = vector.load %arg2[%c0, %c0_0] : memref<3x256xi32, #tpu.memory_space<vmem>>, vector<1x256xi32>
    %c1 = arith.constant 1 : index
    %c0_1 = arith.constant 0 : index
    %1 = vector.load %arg2[%c1, %c0_1] : memref<3x256xi32, #tpu.memory_space<vmem>>, vector<1x256xi32>
    %c2 = arith.constant 2 : index
    %c0_2 = arith.constant 0 : index
    %2 = vector.load %arg2[%c2, %c0_2] : memref<3x256xi32, #tpu.memory_space<vmem>>, vector<1x256xi32>
    %c0_3 = arith.constant 0 : index
    %c3 = arith.constant 3 : index
    %3 = vector.load %arg1[%c0_3, %c3] : memref<8x4xi32, #tpu.memory_space<vmem>>, vector<8x1xi32>
    %c2_i32 = arith.constant 2 : i32
    %4 = vector.broadcast %c2_i32 : i32 to vector<1x256xi32>
    %5 = arith.cmpi eq, %2, %4 : vector<1x256xi32>
    %c0_4 = arith.constant 0 : index
    %c2_5 = arith.constant 2 : index
    %6 = vector.load %arg1[%c0_4, %c2_5] : memref<8x4xi32, #tpu.memory_space<vmem>>, vector<8x1xi32>
    %7 = vector.shape_cast %5 : vector<1x256xi1> to vector<1x256xi1>
    %8 = vector.broadcast %7 : vector<1x256xi1> to vector<8x256xi1>
    %9 = vector.shape_cast %6 : vector<8x1xi32> to vector<8x1xi32>
    %10 = vector.broadcast %9 : vector<8x1xi32> to vector<8x256xi32>
    %11 = vector.shape_cast %3 : vector<8x1xi32> to vector<8x1xi32>
    %12 = vector.broadcast %11 : vector<8x1xi32> to vector<8x256xi32>
    %13 = arith.select %8, %10, %12 : vector<8x256xi1>, vector<8x256xi32>
    %c1_i32 = arith.constant 1 : i32
    %14 = vector.broadcast %c1_i32 : i32 to vector<1x256xi32>
    %15 = arith.cmpi eq, %2, %14 : vector<1x256xi32>
    %c0_6 = arith.constant 0 : index
    %c1_7 = arith.constant 1 : index
    %16 = vector.load %arg1[%c0_6, %c1_7] : memref<8x4xi32, #tpu.memory_space<vmem>>, vector<8x1xi32>
    %17 = vector.shape_cast %15 : vector<1x256xi1> to vector<1x256xi1>
    %18 = vector.broadcast %17 : vector<1x256xi1> to vector<8x256xi1>
    %19 = vector.shape_cast %16 : vector<8x1xi32> to vector<8x1xi32>
    %20 = vector.broadcast %19 : vector<8x1xi32> to vector<8x256xi32>
    %21 = arith.select %18, %20, %13 : vector<8x256xi1>, vector<8x256xi32>
    %c0_i32 = arith.constant 0 : i32
    %22 = vector.broadcast %c0_i32 : i32 to vector<1x256xi32>
    %23 = arith.cmpi eq, %2, %22 : vector<1x256xi32>
    %c0_8 = arith.constant 0 : index
    %c0_9 = arith.constant 0 : index
    %24 = vector.load %arg1[%c0_8, %c0_9] : memref<8x4xi32, #tpu.memory_space<vmem>>, vector<8x1xi32>
    %25 = vector.shape_cast %23 : vector<1x256xi1> to vector<1x256xi1>
    %26 = vector.broadcast %25 : vector<1x256xi1> to vector<8x256xi1>
    %27 = vector.shape_cast %24 : vector<8x1xi32> to vector<8x1xi32>
    %28 = vector.broadcast %27 : vector<8x1xi32> to vector<8x256xi32>
    %29 = arith.select %26, %28, %21 : vector<8x256xi1>, vector<8x256xi32>
    %30 = vector.broadcast %0 : vector<1x256xi32> to vector<8x256xi32>
    %31 = arith.andi %29, %30 : vector<8x256xi32>
    %32 = vector.broadcast %1 : vector<1x256xi32> to vector<8x256xi32>
    %33 = arith.cmpi eq, %31, %32 : vector<8x256xi32>
    %34 = arith.extui %33 : vector<8x256xi1> to vector<8x256xi32>
    %35 = arith.sitofp %34 : vector<8x256xi32> to vector<8x256xf32>
    %c0_10 = arith.constant 0 : index
    %c0_11 = arith.constant 0 : index
    %36 = vector.load %arg3[%c0_10, %c0_11] : memref<256x128xf32, #tpu.memory_space<vmem>>, vector<256x128xf32>
    %cst = arith.constant dense<0.000000e+00> : vector<8x128xf32>
    %37 = tpu.matmul %35, %36, %cst {dimension_numbers = #tpu.dot_dimension_numbers<[1], [0], [0], [1], [0, 0, 1, 1], [], []>} : vector<8x256xf32>, vector<256x128xf32>, vector<8x128xf32> -> vector<8x128xf32>
    %c0_12 = arith.constant 0 : index
    %c0_13 = arith.constant 0 : index
    %38 = vector.load %arg4[%c0_12, %c0_13] : memref<8x128xf32, #tpu.memory_space<vmem>>, vector<8x128xf32>
    tpu.vector_store %arg4[%c0_12, %c0_13], %37 {strides = array<i32>} : memref<8x128xf32, #tpu.memory_space<vmem>>, vector<8x128xf32>,
    return
  }
  func.func @transform_0(%arg0: i32) -> (i32, i32) {
    %c0_i32 = arith.constant 0 : i32
    %c0_i32_0 = arith.constant 0 : i32
    return %arg0, %c0_i32 : i32, i32
  }
  func.func @transform_1(%arg0: i32) -> (i32, i32) {
    %c0_i32 = arith.constant 0 : i32
    %c0_i32_0 = arith.constant 0 : i32
    %c0_i32_1 = arith.constant 0 : i32
    return %c0_i32, %c0_i32_0 : i32, i32
  }
  func.func @transform_2(%arg0: i32) -> (i32, i32) {
    %c0_i32 = arith.constant 0 : i32
    %c0_i32_0 = arith.constant 0 : i32
    %c0_i32_1 = arith.constant 0 : i32
    return %c0_i32, %c0_i32_0 : i32, i32
  }
  func.func @transform_3(%arg0: i32) -> (i32, i32) {
    %c0_i32 = arith.constant 0 : i32
    %c0_i32_0 = arith.constant 0 : i32
    return %arg0, %c0_i32 : i32, i32
  }
}

</mosaic_0001>

<bundles_post_ra>
// kernel: stamp_embedding.1
= control target key start
LH: loop header
LB: loop body
LE: loop exit
PB: predicated region body
PF: predicated region fallthrough
CT: control target
= control target key end

     0   :  { %v288_v0 = vmov 2   ;;  %v289_v2 = vmov 1   ;;  %v290_v17 = vmov 3   ;;  %v291_v18 = vmov 0   ;;  %s429_s0 = inlined_call_operand.vmem [shape: s32[8,4], index: 0, kind: input, shape index: {}]   ;;  %s430_s2 = inlined_call_operand.vmem [shape: f32[256,128], index: 2, kind: input, shape index: {}]   ;;  %s431_s1 = inlined_call_operand.vmem [shape: s32[3,256], index: 1, kind: input, shape index: {}]   ;;  %s432_s3 = inlined_call_operand.vmem [shape: f32[8,128], index: 3, kind: output, shape index: {}]  }
   0x1   :  { %283 = vset.pattern.permute.xlu0 %v288_v0  ;;  %v19_v1 = vld [vmem:[%s429_s0] sm:$0xff]  ;;  %285 = vset.pattern.permute.xlu1 %v289_v2  ;;  %v115_v4 = vld [vmem:[%s430_s2 + $0x88] sm:$0xff]  ;;  %v116_v8 = vld [vmem:[%s430_s2 + $0x90] sm:$0xff]  ;;  %v22_v53 = vlaneseq }
   0x2   :  { %v114_v3 = vld [vmem:[%s430_s2 + $0x80] sm:$0xff]  ;;  %33 = vperm.xlu0 %283, %v19_v1   ;;  %53 = vperm.xlu1 %285, %v19_v1   ;;  %v99_v7 = vld [vmem:[%s430_s2 + $0x8] sm:$0xff]  ;;  %v117_v10 = vld [vmem:[%s430_s2 + $0x98] sm:$0xff] }
   0x3   :  { %v246_v5 = vpack.c.bf16 %v115_v4, %v114_v3  ;;  %v98_v6 = vld [vmem:[%s430_s2] sm:$0xff]  ;;  %v100_v11 = vld [vmem:[%s430_s2 + $0x10] sm:$0xff]  ;;  %v101_v12 = vld [vmem:[%s430_s2 + $0x18] sm:$0xff]  ;;  %v250_v13 = vpack.c.bf16 %v117_v10, %v116_v8  ;;  %v23_v55 = vshrl.u32 %v22_v53, 7 }
   0x4   :  { %v248_v9 = vpack.c.bf16 %v99_v7, %v98_v6  ;;  %v118_v14 = vld [vmem:[%s430_s2 + $0xa0] sm:$0xff]  ;;  %v119_v15 = vld [vmem:[%s430_s2 + $0xa8] sm:$0xff]  ;;  %v252_v16 = vpack.c.bf16 %v101_v12, %v100_v11  ;;  %v120_v22 = vld [vmem:[%s430_s2 + $0xb0] sm:$0xff] }
   0x5   :  { %247 = vmatprep.subr.bf16.mxu0 %v246_v5  ;;  %v254_v19 = vpack.c.bf16 %v119_v15, %v118_v14  ;;  %v102_v20 = vld [vmem:[%s430_s2 + $0x20] sm:$0xff]  ;;  %v103_v21 = vld [vmem:[%s430_s2 + $0x28] sm:$0xff]  ;;  %v121_v23 = vld [vmem:[%s430_s2 + $0xb8] sm:$0xff]  ;;  %v24_v56 = vsub.s32 0, %v23_v55  ;;  %v28_v57 = vsub.s32 1, %v23_v55 }
   0x6   :  { %249 = vmatpush3.bf16.msra.mxu0 %v248_v9  ;;  %284 = vset.pattern.permute.xlu0 %v290_v17  ;;  %v256_v24 = vpack.c.bf16 %v103_v21, %v102_v20  ;;  %v258_v25 = vpack.c.bf16 %v121_v23, %v120_v22  ;;  %v104_v26 = vld [vmem:[%s430_s2 + $0x30] sm:$0xff]  ;;  %v105_v27 = vld [vmem:[%s430_s2 + $0x38] sm:$0xff]  ;;  %v122_v28 = vld [vmem:[%s430_s2 + $0xc0] sm:$0xff]  ;;  %v292_v21 = vmov 1.0  }
   0x7   :  { %286 = vset.pattern.permute.xlu1 %v291_v18  ;;  %36 = vperm.xlu0 %284, %v19_v1   ;;  %v123_v29 = vld [vmem:[%s430_s2 + $0xc8] sm:$0xff]  ;;  %v260_v30 = vpack.c.bf16 %v105_v27, %v104_v26  ;;  %v106_v32 = vld [vmem:[%s430_s2 + $0x40] sm:$0xff]  ;;  %v124_v34 = vld [vmem:[%s430_s2 + $0xd0] sm:$0xff] }
   0x8   :  { %70 = vperm.xlu1 %286, %v19_v1   ;;  %251 = vmatprep.subr.bf16.mxu0 %v250_v13  ;;  %v262_v31 = vpack.c.bf16 %v123_v29, %v122_v28  ;;  %v107_v33 = vld [vmem:[%s430_s2 + $0x48] sm:$0xff]  ;;  %v125_v35 = vld [vmem:[%s430_s2 + $0xd8] sm:$0xff]  ;;  %v108_v38 = vld [vmem:[%s430_s2 + $0x50] sm:$0xff] }
   0x9   :  { %v264_v36 = vpack.c.bf16 %v107_v33, %v106_v32  ;;  %v266_v37 = vpack.c.bf16 %v125_v35, %v124_v34  ;;  %v109_v39 = vld [vmem:[%s430_s2 + $0x58] sm:$0xff]  ;;  %v126_v40 = vld [vmem:[%s430_s2 + $0xe0] sm:$0xff]  ;;  %v127_v41 = vld [vmem:[%s430_s2 + $0xe8] sm:$0xff] }
   0xa   :  { %253 = vmatpush3.bf16.msra.mxu0 %v252_v16  ;;  %v268_v42 = vpack.c.bf16 %v109_v39, %v108_v38  ;;  %v270_v43 = vpack.c.bf16 %v127_v41, %v126_v40  ;;  %v110_v44 = vld [vmem:[%s430_s2 + $0x60] sm:$0xff]  ;;  %v111_v45 = vld [vmem:[%s430_s2 + $0x68] sm:$0xff]  ;;  %v128_v46 = vld [vmem:[%s430_s2 + $0xf0] sm:$0xff] }
   0xb   :  { %255 = vmatprep.subr.bf16.mxu0 %v254_v19  ;;  %287 = vset.pattern.permute.xlu0 %v291_v18  ;;  %v129_v47 = vld [vmem:[%s430_s2 + $0xf8] sm:$0xff]  ;;  %v272_v48 = vpack.c.bf16 %v111_v45, %v110_v44  ;;  %v112_v50 = vld [vmem:[%s430_s2 + $0x70] sm:$0xff]  ;;  %v206_v54 = vld [vmem:[%s431_s1 + $0x2] ss:$4 sm:$0x3] }
   0xc   :  { %v274_v49 = vpack.c.bf16 %v129_v47, %v128_v46  ;;  %v113_v51 = vld [vmem:[%s430_s2 + $0x78] sm:$0xff]  ;;  %vm20_vm0 = vcmp.eq.s32.totalorder %v206_v54, 2  ;;  %vm40_vm1 = vcmp.eq.s32.totalorder %v206_v54, 1  ;;  %vm57_vm2 = vcmp.eq.s32.totalorder %v206_v54, 0 }
   0xd   :  { %v276_v52 = vpack.c.bf16 %v113_v51, %v112_v50  ;;  %v21_v58 = vsel %vm20_vm0, 1, %v291_v18  ;;  %v41_v59 = vsel %vm40_vm1, 1, %v291_v18  ;;  %v58_v60 = vsel %vm57_vm2, 1, %v291_v18  ;;  %v14_v5 = vld [vmem:[%s431_s1] ss:$4 sm:$0x3] }
   0xe   :  { %257 = vmatpush3.bf16.msra.mxu0 %v256_v24  ;;  %v25_v61 = vrot.slane %v21_v58, %v24_v56  ;;  %v29_v62 = vrot.slane %v21_v58, %v28_v57  ;;  %v45_v1 = vrot.slane %v41_v59, %v24_v56  ;;  %v49_v2 = vrot.slane %v41_v59, %v28_v57  ;;  %v205_v6 = vld [vmem:[%s431_s1 + $0x1] ss:$4 sm:$0x3] }
   0xf   :  { %259 = vmatprep.subr.bf16.mxu0 %v258_v25  ;;  %v62_v3 = vrot.slane %v58_v60, %v24_v56  ;;  %v66_v4 = vrot.slane %v58_v60, %v28_v57  ;;  %v77_v8 = vrot.slane %v14_v5, %v24_v56  ;;  %v81_v10 = vrot.slane %v14_v5, %v28_v57 }
  0x10   :  { %vm30_vm3 = vcmp.eq.s32.totalorder %v25_v61, 1  ;;  %vm31_vm4 = vcmp.eq.s32.totalorder %v29_v62, 1  ;;  %vm50_vm5 = vcmp.eq.s32.totalorder %v45_v1, 1  ;;  %vm51_vm6 = vcmp.eq.s32.totalorder %v49_v2, 1 }
  0x11   :  { %vm67_vm7 = vcmp.eq.s32.totalorder %v62_v3, 1  ;;  %vm68_vm8 = vcmp.eq.s32.totalorder %v66_v4, 1  ;;  %v87_v15 = vrot.slane %v205_v6, %v24_v56  ;;  %v91_v16 = vrot.slane %v205_v6, %v28_v57 }
  0x12   :  { %261 = vmatpush3.bf16.msra.mxu0 %v260_v30 }
  0x13   :  { %263 = vmatprep.subr.bf16.mxu0 %v262_v31 }
  0x16   :  { %265 = vmatpush3.bf16.msra.mxu0 %v264_v36 }
  0x17   :  { %267 = vmatprep.subr.bf16.mxu0 %v266_v37 }
  0x1a   :  { %269 = vmatpush3.bf16.msra.mxu0 %v268_v42 }
  0x1b   :  { %271 = vmatprep.subr.bf16.mxu0 %v270_v43 }
  0x1e   :  { %273 = vmatpush3.bf16.msra.mxu0 %v272_v48 }
  0x1f   :  { %275 = vmatprep.subr.bf16.mxu0 %v274_v49 }
  0x22   :  { %277 = vmatpush3.bf16.msra.mxu0 %v276_v52 }
  0x81   :  { %v34_v63 = vpop.permute.xlu0 %33  ;;  %v54_v0 = vpop.permute.xlu1 %53 }
  0x86   :  { %v37_v7 = vpop.permute.xlu0 %36 }
  0x87   :  { %v71_v9 = vpop.permute.xlu1 %70  ;;  %v38_v11 = vsel %vm30_vm3, %v34_v63, %v37_v7  ;;  %v39_v12 = vsel %vm31_vm4, %v34_v63, %v37_v7 }
  0x88   :  { %v55_v13 = vsel %vm50_vm5, %v54_v0, %v38_v11  ;;  %v56_v14 = vsel %vm51_vm6, %v54_v0, %v39_v12 }
  0x89   :  { %v72_v17 = vsel %vm67_vm7, %v71_v9, %v55_v13  ;;  %v73_v18 = vsel %vm68_vm8, %v71_v9, %v56_v14 }
  0x8a   :  { %v82_v19 = vand.u32 %v77_v8, %v72_v17  ;;  %v83_v20 = vand.u32 %v81_v10, %v73_v18 }
  0x8c   :  { %vm93_vm9 = vcmp.eq.s32.totalorder %v83_v20, %v91_v16  ;;  %vm92_vm10 = vcmp.eq.s32.totalorder %v82_v19, %v87_v15 }
  0x8d   :  { %209 = vmatprep.mubr.msk.f32.mxu0 %vm93_vm9, %v292_v21 }
  0x8e   :  { %210 = vmatmul.mubr.msk.f32.vlgmr.msra.gmra.mrb[0].mxu0 %vm92_vm10, %v292_v21 }
 0x161   :  { %v243_v22 = vpop.f32.mrb[0].mxu0 }
 0x162   :  { %v244_v23 = vpop.f32.mrb[1].mxu0 }
 0x163   :  { %v245_v24 = vadd.f32 %v244_v23, %v243_v22 }
 0x165   :  { %200 = vst [vmem:[%s432_s3] sm:$0xff] %v245_v24 }

</bundles_post_ra>
